<compile_context>
chip_gen: v5e
topology: v5e:2x2
jax: 0.10.0
libtpu: 0.0.40
codegen_flags: <defaults>
</compile_context>

<pallas_src>
import functools

import jax
import jax.numpy as jnp
from jax.experimental import pallas as pl
from jax.experimental.pallas import tpu as pltpu

_NS_ITERS = 18   # coupled Newton-Schulz iterations (quadratically convergent, safe margin)
_EPS = 1e-30     # keeps padded (all-zero) batch lanes finite / NaN-free


def _stiefel_polar_kernel(x_ref, o_ref, *, rank: int, ns_iters: int):
    # x_ref / o_ref tile: (rank, dim, TB) f32, element [r, d, b] == mat[b, d, r].
    m = x_ref[...]
    tb = m.shape[2]

    # --- Gram matrix (per batch lane):  g[i, j, b] = sum_d m[i, d, b] * m[j, d, b] ---
    g = jnp.stack([jnp.sum(m[i] * m, axis=1) for i in range(rank)], axis=0)  # (rank, rank, TB)

    eye2d = (jax.lax.broadcasted_iota(jnp.int32, (rank, rank), 0)
             == jax.lax.broadcasted_iota(jnp.int32, (rank, rank), 1)).astype(jnp.float32)
    eye_tb = jnp.broadcast_to(eye2d[:, :, None], (rank, rank, tb))           # hoisted once

    # --- trace scaling: eigenvalues of A = gram / trace lie in (0, 1] -> NS converges ---
    c = jnp.sum(g * eye_tb, axis=(0, 1), keepdims=True)                      # (1, 1, TB)
    inv_c = 1.0 / (c + _EPS)
    rsqrt_c = jax.lax.rsqrt(c + _EPS)

    def _mm(a, b):  # per-lane (rank x rank) @ (rank x rank): contract the shared index
        return jnp.sum(a[:, :, None, :] * b[None, :, :, :], axis=1)          # (rank, rank, TB)

    # --- coupled Newton-Schulz:  Y_k -> A^{1/2},  Z_k -> A^{-1/2} ---
    def ns_body(_, carry):
        y, z = carry
        t = 1.5 * eye_tb - 0.5 * _mm(z, y)
        return _mm(y, t), _mm(t, z)

    y0 = g * inv_c
    z0 = eye_tb
    _, z = jax.lax.fori_loop(0, ns_iters, ns_body, (y0, z0))

    # inv_sqrt(gram)[r, k, b] = z[r, k, b] / sqrt(c[b])
    w = z * rsqrt_c                                                          # (rank, rank, TB)

    # --- projection:  out[k, d, b] = sum_r m[r, d, b] * w[r, k, b] ---
    out = jnp.stack([jnp.sum(m * w[:, k:k + 1, :], axis=0) for k in range(rank)], axis=0)
    o_ref[...] = out                                                         # (rank, dim, TB)


def _pick_tile_b(batch: int, dim: int, rank: int) -> int:
    # Cap TB so the f32 I/O tile (rank*dim*TB) AND the rank^3 Newton-Schulz intermediate
    # (rank^3*TB) stay around 1 MiB -> double-buffered tiles + scratch fit scoped VMEM
    # comfortably on v5e/v6e and v7x's smaller 64 MiB physical VMEM.
    denom = 4 * max(dim * rank, rank * rank * rank)
    cap = (1 << 20) // max(denom, 1)
    cap = max(128, (cap // 128) * 128)       # when tiling, TB must be a multiple of 128 lanes
    if batch <= cap:
        return batch                          # single full-width block (full-dim exemption)
    return cap


@functools.partial(jax.jit, static_argnames=("dim", "rank", "tile_b"))
def stiefel_polar(theta, dim: int, rank: int, tile_b: int | None = None):
    """Map real theta (..., dim*rank) to Stiefel matrices (..., dim, rank) via polar decomposition."""
    # TODO(synk): complex-dtype path (theta last dim == 2*dim*rank) and the other Stiefel
    # parametrizations (qr / choleskyL / so-exp / so-cayley) are not implemented here.
    shape = theta.shape
    assert shape[-1] == dim * rank, "real polar parametrization expects dim*rank params"
    mat = theta.reshape(-1, dim, rank).astype(jnp.float32)
    batch = mat.shape[0]

    # Lane-dense layout plumbing (outside the kernel): element [r, d, b] <-> mat[b, d, r].
    xt = mat.transpose(2, 1, 0)               # (rank, dim, batch)

    tb = _pick_tile_b(batch, dim, rank) if tile_b is None else tile_b
    n_steps = pl.cdiv(batch, tb)
    batch_p = n_steps * tb
    if batch_p != batch:
        xt = jnp.pad(xt, ((0, 0), (0, 0), (0, batch_p - batch)))   # zero lanes stay finite

    ns_iters = 0 if rank == 1 else _NS_ITERS  # rank==1 reduces to column normalization
    out = pl.pallas_call(
        functools.partial(_stiefel_polar_kernel, rank=rank, ns_iters=ns_iters),
        out_shape=jax.ShapeDtypeStruct((rank, dim, batch_p), jnp.float32),
        grid=(n_steps,),
        in_specs=[pl.BlockSpec((rank, dim, tb), lambda b: (0, 0, b))],
        out_specs=pl.BlockSpec((rank, dim, tb), lambda b: (0, 0, b)),
        compiler_params=pltpu.CompilerParams(dimension_semantics=("parallel",)),
    )(xt)

    ret = out[:, :, :batch].transpose(2, 1, 0)                      # (batch, dim, rank)
    return ret.reshape(*shape[:-1], dim, rank)


def _reference_polar(theta, dim, rank):
    mat = theta.reshape(-1, dim, rank).astype(jnp.float32)
    if rank == 1:
        ret = mat / jnp.linalg.norm(mat, axis=1, keepdims=True)
    else:
        gram = jnp.einsum("bdi,bdj->bij", mat, mat)
        evl, evc = jnp.linalg.eigh(gram)
        inv_sqrt = jnp.einsum("bik,bk,bjk->bij", evc, 1.0 / jnp.sqrt(evl), evc)
        ret = jnp.einsum("bdr,brk->bdk", mat, inv_sqrt)
    return ret.reshape(*theta.shape[:-1], dim, rank)


if __name__ == "__main__":
    # Module config: Stiefel(dim=16, rank=4, batch_size=2, method='polar', dtype=torch.float32)
    # -> theta parameter shape (2, dim*rank) = (2, 64).
    dim, rank, batch_size = 16, 4, 2
    key = jax.random.PRNGKey(0)
    theta = jax.random.normal(key, (batch_size, dim * rank), dtype=jnp.float32)

    out = jax.block_until_ready(stiefel_polar(theta, dim, rank))
    assert out.shape == (batch_size, dim, rank)
    eye = jnp.einsum("bdi,bdj->bij", out, out)
    assert jnp.max(jnp.abs(eye - jnp.eye(rank)[None])) < 1e-4
    ref = _reference_polar(theta, dim, rank)
    assert jnp.max(jnp.abs(out - ref)) < 1e-4

    # Also exercise the tiled / padded multi-step grid path (3 grid steps, zero-padded lanes).
    theta2 = jax.random.normal(jax.random.PRNGKey(1), (260, dim * rank), dtype=jnp.float32)
    out2 = jax.block_until_ready(stiefel_polar(theta2, dim, rank, tile_b=128))
    assert out2.shape == (260, dim, rank)
    eye2 = jnp.einsum("bdi,bdj->bij", out2, out2)
    assert jnp.max(jnp.abs(eye2 - jnp.eye(rank)[None])) < 1e-4

    print("KERNEL_OK")
</pallas_src>

<mosaic_0001>
module attributes {stable_mosaic.version = 11 : i64} {
  func.func @_stiefel_polar_kernel(%arg0: i32, %arg1: memref<4x16x2xf32, #tpu.memory_space<vmem>>, %arg2: memref<4x16x2xf32, #tpu.memory_space<vmem>>) attributes {dimension_semantics = [#tpu.dimension_semantics<parallel>], iteration_bounds = array<i64: 1>, scalar_prefetch = 0 : i64, scratch_operands = 0 : i64, tpu.core_type = #tpu.core_type<tc>, window_params = [{transform_indices = @transform_0, window_bounds = array<i64: 4, 16, 2>}, {transform_indices = @transform_1, window_bounds = array<i64: 4, 16, 2>}]} {
    %c0 = arith.constant 0 : index
    %c0_0 = arith.constant 0 : index
    %c0_1 = arith.constant 0 : index
    %0 = vector.load %arg1[%c0, %c0_0, %c0_1] : memref<4x16x2xf32, #tpu.memory_space<vmem>>, vector<4x16x2xf32>
    %1 = vector.extract_strided_slice %0 {offsets = [0, 0, 0], sizes = [1, 16, 2], strides = [1, 1, 1]} : vector<4x16x2xf32> to vector<1x16x2xf32>
    %2 = vector.shape_cast %1 : vector<1x16x2xf32> to vector<16x2xf32>
    %3 = vector.shape_cast %2 : vector<16x2xf32> to vector<1x16x2xf32>
    %4 = vector.broadcast %3 : vector<1x16x2xf32> to vector<4x16x2xf32>
    %5 = arith.mulf %4, %0 : vector<4x16x2xf32>
    %cst = arith.constant dense<0.000000e+00> : vector<4x2xf32>
    %6 = vector.multi_reduction <add>, %5, %cst [1] : vector<4x16x2xf32> to vector<4x2xf32>
    %7 = vector.extract_strided_slice %0 {offsets = [1, 0, 0], sizes = [1, 16, 2], strides = [1, 1, 1]} : vector<4x16x2xf32> to vector<1x16x2xf32>
    %8 = vector.shape_cast %7 : vector<1x16x2xf32> to vector<16x2xf32>
    %9 = vector.shape_cast %8 : vector<16x2xf32> to vector<1x16x2xf32>
    %10 = vector.broadcast %9 : vector<1x16x2xf32> to vector<4x16x2xf32>
    %11 = arith.mulf %10, %0 : vector<4x16x2xf32>
    %cst_2 = arith.constant dense<0.000000e+00> : vector<4x2xf32>
    %12 = vector.multi_reduction <add>, %11, %cst_2 [1] : vector<4x16x2xf32> to vector<4x2xf32>
    %13 = vector.extract_strided_slice %0 {offsets = [2, 0, 0], sizes = [1, 16, 2], strides = [1, 1, 1]} : vector<4x16x2xf32> to vector<1x16x2xf32>
    %14 = vector.shape_cast %13 : vector<1x16x2xf32> to vector<16x2xf32>
    %15 = vector.shape_cast %14 : vector<16x2xf32> to vector<1x16x2xf32>
    %16 = vector.broadcast %15 : vector<1x16x2xf32> to vector<4x16x2xf32>
    %17 = arith.mulf %16, %0 : vector<4x16x2xf32>
    %cst_3 = arith.constant dense<0.000000e+00> : vector<4x2xf32>
    %18 = vector.multi_reduction <add>, %17, %cst_3 [1] : vector<4x16x2xf32> to vector<4x2xf32>
    %19 = vector.extract_strided_slice %0 {offsets = [3, 0, 0], sizes = [1, 16, 2], strides = [1, 1, 1]} : vector<4x16x2xf32> to vector<1x16x2xf32>
    %20 = vector.shape_cast %19 : vector<1x16x2xf32> to vector<16x2xf32>
    %21 = vector.shape_cast %20 : vector<16x2xf32> to vector<1x16x2xf32>
    %22 = vector.broadcast %21 : vector<1x16x2xf32> to vector<4x16x2xf32>
    %23 = arith.mulf %22, %0 : vector<4x16x2xf32>
    %cst_4 = arith.constant dense<0.000000e+00> : vector<4x2xf32>
    %24 = vector.multi_reduction <add>, %23, %cst_4 [1] : vector<4x16x2xf32> to vector<4x2xf32>
    %25 = vector.shape_cast %6 : vector<4x2xf32> to vector<1x4x2xf32>
    %26 = vector.shape_cast %12 : vector<4x2xf32> to vector<1x4x2xf32>
    %27 = vector.shape_cast %18 : vector<4x2xf32> to vector<1x4x2xf32>
    %28 = vector.shape_cast %24 : vector<4x2xf32> to vector<1x4x2xf32>
    %29 = tpu.concatenate %25, %26, %27, %28 in 0 : vector<1x4x2xf32>, vector<1x4x2xf32>, vector<1x4x2xf32>, vector<1x4x2xf32> -> vector<4x4x2xf32>
    %30 = tpu.iota {dimensions = array<i32: 0>} : vector<4x4xi32>
    %31 = tpu.iota {dimensions = array<i32: 1>} : vector<4x4xi32>
    %32 = arith.cmpi eq, %30, %31 : vector<4x4xi32>
    %33 = arith.extui %32 : vector<4x4xi1> to vector<4x4xi32>
    %34 = arith.sitofp %33 : vector<4x4xi32> to vector<4x4xf32>
    %35 = vector.shape_cast %34 : vector<4x4xf32> to vector<4x4x1xf32>
    %36 = vector.shape_cast %35 : vector<4x4x1xf32> to vector<4x4x1xf32>
    %37 = vector.broadcast %36 : vector<4x4x1xf32> to vector<4x4x2xf32>
    %38 = arith.mulf %29, %37 : vector<4x4x2xf32>
    %cst_5 = arith.constant dense<0.000000e+00> : vector<2xf32>
    %39 = vector.multi_reduction <add>, %38, %cst_5 [0, 1] : vector<4x4x2xf32> to vector<2xf32>
    %40 = vector.shape_cast %39 : vector<2xf32> to vector<1x1x2xf32>
    %cst_6 = arith.constant 1.000000e-30 : f32
    %41 = vector.broadcast %cst_6 : f32 to vector<1x1x2xf32>
    %42 = arith.addf %40, %41 : vector<1x1x2xf32>
    %cst_7 = arith.constant 1.000000e+00 : f32
    %43 = vector.broadcast %cst_7 : f32 to vector<1x1x2xf32>
    %44 = arith.divf %43, %42 : vector<1x1x2xf32>
    %cst_8 = arith.constant 1.000000e-30 : f32
    %45 = vector.broadcast %cst_8 : f32 to vector<1x1x2xf32>
    %46 = arith.addf %40, %45 : vector<1x1x2xf32>
    %47 = math.rsqrt %46 : vector<1x1x2xf32>
    %48 = vector.broadcast %44 : vector<1x1x2xf32> to vector<4x4x2xf32>
    %49 = arith.mulf %29, %48 : vector<4x4x2xf32>
    %c0_i32 = arith.constant 0 : i32
    %c18_i32 = arith.constant 18 : i32
    %50 = arith.addi %c0_i32, %c18_i32 : i32
    %c1_i32 = arith.constant 1 : i32
    %51:2 = scf.for %arg3 = %c0_i32 to %50 step %c1_i32 iter_args(%arg4 = %49, %arg5 = %37) -> (vector<4x4x2xf32>, vector<4x4x2xf32>)  : i32 {
      %cst_16 = arith.constant 1.500000e+00 : f32
      %76 = vector.broadcast %cst_16 : f32 to vector<4x4x2xf32>
      %77 = arith.mulf %76, %37 : vector<4x4x2xf32>
      %78 = vector.shape_cast %arg5 : vector<4x4x2xf32> to vector<4x4x1x2xf32>
      %79 = vector.shape_cast %arg4 : vector<4x4x2xf32> to vector<1x4x4x2xf32>
      %80 = vector.broadcast %78 : vector<4x4x1x2xf32> to vector<4x4x4x2xf32>
      %81 = vector.broadcast %79 : vector<1x4x4x2xf32> to vector<4x4x4x2xf32>
      %82 = arith.mulf %80, %81 : vector<4x4x4x2xf32>
      %cst_17 = arith.constant dense<0.000000e+00> : vector<4x4x2xf32>
      %83 = vector.multi_reduction <add>, %82, %cst_17 [1] : vector<4x4x4x2xf32> to vector<4x4x2xf32>
      %cst_18 = arith.constant 5.000000e-01 : f32
      %84 = vector.broadcast %cst_18 : f32 to vector<4x4x2xf32>
      %85 = arith.mulf %84, %83 : vector<4x4x2xf32>
      %86 = arith.subf %77, %85 : vector<4x4x2xf32>
      %87 = vector.shape_cast %arg4 : vector<4x4x2xf32> to vector<4x4x1x2xf32>
      %88 = vector.shape_cast %86 : vector<4x4x2xf32> to vector<1x4x4x2xf32>
      %89 = vector.broadcast %87 : vector<4x4x1x2xf32> to vector<4x4x4x2xf32>
      %90 = vector.broadcast %88 : vector<1x4x4x2xf32> to vector<4x4x4x2xf32>
      %91 = arith.mulf %89, %90 : vector<4x4x4x2xf32>
      %cst_19 = arith.constant dense<0.000000e+00> : vector<4x4x2xf32>
      %92 = vector.multi_reduction <add>, %91, %cst_19 [1] : vector<4x4x4x2xf32> to vector<4x4x2xf32>
      %93 = vector.shape_cast %86 : vector<4x4x2xf32> to vector<4x4x1x2xf32>
      %94 = vector.shape_cast %arg5 : vector<4x4x2xf32> to vector<1x4x4x2xf32>
      %95 = vector.broadcast %93 : vector<4x4x1x2xf32> to vector<4x4x4x2xf32>
      %96 = vector.broadcast %94 : vector<1x4x4x2xf32> to vector<4x4x4x2xf32>
      %97 = arith.mulf %95, %96 : vector<4x4x4x2xf32>
      %cst_20 = arith.constant dense<0.000000e+00> : vector<4x4x2xf32>
      %98 = vector.multi_reduction <add>, %97, %cst_20 [1] : vector<4x4x4x2xf32> to vector<4x4x2xf32>
      scf.yield %92, %98 : vector<4x4x2xf32>, vector<4x4x2xf32>
    }
    %52 = vector.broadcast %47 : vector<1x1x2xf32> to vector<4x4x2xf32>
    %53 = arith.mulf %51#1, %52 : vector<4x4x2xf32>
    %54 = vector.extract_strided_slice %53 {offsets = [0, 0, 0], sizes = [4, 1, 2], strides = [1, 1, 1]} : vector<4x4x2xf32> to vector<4x1x2xf32>
    %55 = vector.broadcast %54 : vector<4x1x2xf32> to vector<4x16x2xf32>
    %56 = arith.mulf %0, %55 : vector<4x16x2xf32>
    %cst_9 = arith.constant dense<0.000000e+00> : vector<16x2xf32>
    %57 = vector.multi_reduction <add>, %56, %cst_9 [0] : vector<4x16x2xf32> to vector<16x2xf32>
    %58 = vector.extract_strided_slice %53 {offsets = [0, 1, 0], sizes = [4, 1, 2], strides = [1, 1, 1]} : vector<4x4x2xf32> to vector<4x1x2xf32>
    %59 = vector.broadcast %58 : vector<4x1x2xf32> to vector<4x16x2xf32>
    %60 = arith.mulf %0, %59 : vector<4x16x2xf32>
    %cst_10 = arith.constant dense<0.000000e+00> : vector<16x2xf32>
    %61 = vector.multi_reduction <add>, %60, %cst_10 [0] : vector<4x16x2xf32> to vector<16x2xf32>
    %62 = vector.extract_strided_slice %53 {offsets = [0, 2, 0], sizes = [4, 1, 2], strides = [1, 1, 1]} : vector<4x4x2xf32> to vector<4x1x2xf32>
    %63 = vector.broadcast %62 : vector<4x1x2xf32> to vector<4x16x2xf32>
    %64 = arith.mulf %0, %63 : vector<4x16x2xf32>
    %cst_11 = arith.constant dense<0.000000e+00> : vector<16x2xf32>
    %65 = vector.multi_reduction <add>, %64, %cst_11 [0] : vector<4x16x2xf32> to vector<16x2xf32>
    %66 = vector.extract_strided_slice %53 {offsets = [0, 3, 0], sizes = [4, 1, 2], strides = [1, 1, 1]} : vector<4x4x2xf32> to vector<4x1x2xf32>
    %67 = vector.broadcast %66 : vector<4x1x2xf32> to vector<4x16x2xf32>
    %68 = arith.mulf %0, %67 : vector<4x16x2xf32>
    %cst_12 = arith.constant dense<0.000000e+00> : vector<16x2xf32>
    %69 = vector.multi_reduction <add>, %68, %cst_12 [0] : vector<4x16x2xf32> to vector<16x2xf32>
    %70 = vector.shape_cast %57 : vector<16x2xf32> to vector<1x16x2xf32>
    %71 = vector.shape_cast %61 : vector<16x2xf32> to vector<1x16x2xf32>
    %72 = vector.shape_cast %65 : vector<16x2xf32> to vector<1x16x2xf32>
    %73 = vector.shape_cast %69 : vector<16x2xf32> to vector<1x16x2xf32>
    %74 = tpu.concatenate %70, %71, %72, %73 in 0 : vector<1x16x2xf32>, vector<1x16x2xf32>, vector<1x16x2xf32>, vector<1x16x2xf32> -> vector<4x16x2xf32>
    %c0_13 = arith.constant 0 : index
    %c0_14 = arith.constant 0 : index
    %c0_15 = arith.constant 0 : index
    %75 = vector.load %arg2[%c0_13, %c0_14, %c0_15] : memref<4x16x2xf32, #tpu.memory_space<vmem>>, vector<4x16x2xf32>
    tpu.vector_store %arg2[%c0_13, %c0_14, %c0_15], %74 {strides = array<i32>} : memref<4x16x2xf32, #tpu.memory_space<vmem>>, vector<4x16x2xf32>,
    return
  }
  func.func @transform_0(%arg0: i32) -> (i32, i32, i32) {
    %c0_i32 = arith.constant 0 : i32
    %c0_i32_0 = arith.constant 0 : i32
    %c0_i32_1 = arith.constant 0 : i32
    return %c0_i32, %c0_i32_0, %arg0 : i32, i32, i32
  }
  func.func @transform_1(%arg0: i32) -> (i32, i32, i32) {
    %c0_i32 = arith.constant 0 : i32
    %c0_i32_0 = arith.constant 0 : i32
    %c0_i32_1 = arith.constant 0 : i32
    return %c0_i32, %c0_i32_0, %arg0 : i32, i32, i32
  }
}

</mosaic_0001>

<bundles_post_ra>
// kernel: stiefel_polar.1
= control target key start
LH: loop header
LB: loop body
LE: loop exit
PB: predicated region body
PF: predicated region fallthrough
CT: control target
= control target key end

     0   :  { %v127_v0 = vlaneseq  ;;  %v959_v3 = vmov 0.0   ;;  %vm24_vm1 = vcmask 15360   ;;  %vm227_vm2 = vcmask 1041409   ;;  %s1557_s1 = inlined_call_operand.vmem [shape: f32[4,16,2], index: 1, kind: output, shape index: {}]   ;;  %s1558_s0 = inlined_call_operand.vmem [shape: f32[4,16,2], index: 0, kind: input, shape index: {}]  }
   0x1   :  { %v973_v11 = vld [vmem:[%s1558_s0] sm:$0xff]  ;;  %v978_v12 = vld [vmem:[%s1558_s0 + $0x8] sm:$0xff]  ;;  %v983_v13 = vld [vmem:[%s1558_s0 + $0x10] sm:$0xff]  ;;  %vm230_vm3 = vcmask 1042434   ;;  %vm233_vm4 = vcmask 1043459   ;;  %vm257_vm5 = vcmask 11264  }
   0x2   :  { %v128_v1 = vshrl.u32 %v127_v0, 7  ;;  %v130_v2 = vand.u32 127, %v127_v0  ;;  %v988_v14 = vld [vmem:[%s1558_s0 + $0x18] sm:$0xff]  ;;  %v993_v15 = vld [vmem:[%s1558_s0 + $0x20] sm:$0xff]  ;;  %v998_v16 = vld [vmem:[%s1558_s0 + $0x28] sm:$0xff]  ;;  %v16_v19 = vmul.f32 %v973_v11, %v973_v11  ;;  %v17_v20 = vmul.f32 %v978_v12, %v978_v12 }
   0x3   :  { %v1003_v17 = vld [vmem:[%s1558_s0 + $0x30] sm:$0xff]  ;;  %v1008_v18 = vld [vmem:[%s1558_s0 + $0x38] sm:$0xff]  ;;  %v18_v21 = vmul.f32 %v983_v13, %v973_v11  ;;  %v61_v22 = vmul.f32 %v983_v13, %v983_v13  ;;  %v62_v23 = vmul.f32 %v988_v14, %v988_v14  ;;  %v19_v24 = vmul.f32 %v988_v14, %v978_v12  ;;  %s1204_s0 = smov 0  }
   0x4   :  { %872 = vset.pattern.permute.xlu0 %v128_v1  ;;  %vm131_vm0 = vcmp.eq.s32.totalorder %v128_v1, %v130_v2  ;;  %v63_v25 = vmul.f32 %v993_v15, %v983_v13  ;;  %v64_v26 = vmul.f32 %v998_v16, %v988_v14  ;;  %v20_v27 = vmul.f32 %v993_v15, %v973_v11 }
   0x5   :  { %v798_v4 = vsel %vm131_vm0, 1.0, %v959_v3  ;;  %v21_v28 = vmul.f32 %v998_v16, %v978_v12  ;;  %v22_v29 = vmul.f32 %v1003_v17, %v973_v11  ;;  %v23_v30 = vmul.f32 %v1008_v18, %v978_v12 }
   0x6   :  { %v134_v5 = vperm.slane %v798_v4, 0  ;;  %v141_v6 = vperm.slane %v798_v4, 1  ;;  %v148_v8 = vperm.slane %v798_v4, 2  ;;  %v155_v9 = vperm.slane %v798_v4, 3 }
   0x7   :  { %v65_v31 = vmul.f32 %v1003_v17, %v983_v13  ;;  %v66_v32 = vmul.f32 %v1008_v18, %v988_v14  ;;  %v25_v33 = vsel %vm24_vm1, %v16_v19, 0.0  ;;  %v26_v34 = vsel %vm24_vm1, %v17_v20, 0.0 }
   0x8   :  { %v873_v7 = vpack.i.bf16 %v141_v6, %v134_v5  ;;  %v878_v10 = vpack.i.bf16 %v155_v9, %v148_v8  ;;  %v67_v35 = vsel %vm24_vm1, %v61_v22, 0.0  ;;  %v68_v36 = vsel %vm24_vm1, %v62_v23, 0.0 }
   0x9   :  { %v34_v37 = vsel %vm24_vm1, %v18_v21, 0.0  ;;  %v35_v38 = vsel %vm24_vm1, %v19_v24, 0.0  ;;  %v76_v39 = vsel %vm24_vm1, %v63_v25, 0.0  ;;  %v77_v40 = vsel %vm24_vm1, %v64_v26, 0.0 }
   0xa   :  { %v43_v41 = vsel %vm24_vm1, %v20_v27, 0.0  ;;  %v44_v42 = vsel %vm24_vm1, %v21_v28, 0.0  ;;  %v52_v43 = vsel %vm24_vm1, %v22_v29, 0.0  ;;  %v53_v44 = vsel %vm24_vm1, %v23_v30, 0.0 }
   0xb   :  { %v27_v45 = vadd.f32 %v26_v34, %v25_v33  ;;  %v69_v46 = vadd.f32 %v68_v36, %v67_v35  ;;  %v85_v47 = vsel %vm24_vm1, %v65_v31, 0.0  ;;  %v86_v48 = vsel %vm24_vm1, %v66_v32, 0.0 }
   0xc   :  { %874 = vperm.xlu0 %872, %v873_v7   ;;  %v36_v49 = vadd.f32 %v35_v38, %v34_v37  ;;  %v78_v50 = vadd.f32 %v77_v40, %v76_v39  ;;  %v94_v51 = vmul.f32 %v993_v15, %v993_v15  ;;  %v95_v52 = vmul.f32 %v998_v16, %v998_v16 }
   0xd   :  { %v45_v53 = vadd.f32 %v44_v42, %v43_v41  ;;  %v54_v54 = vadd.f32 %v53_v44, %v52_v43  ;;  %v96_v55 = vmul.f32 %v1003_v17, %v993_v15  ;;  %v97_v56 = vmul.f32 %v1008_v18, %v998_v16 }
   0xe   :  { %v87_v57 = vadd.f32 %v86_v48, %v85_v47  ;;  %v116_v58 = vmul.f32 %v1003_v17, %v1003_v17  ;;  %v117_v59 = vmul.f32 %v1008_v18, %v1008_v18  ;;  %v28_v60 = vrot.slane %v27_v45, 4 }
   0xf   :  { %v70_v61 = vrot.slane %v69_v46, 4  ;;  %v37_v62 = vrot.slane %v36_v49, 4  ;;  %v79_v63 = vrot.slane %v78_v50, 4  ;;  %v98_v0 = vsel %vm24_vm1, %v94_v51, 0.0 }
  0x10   :  { %v99_v1 = vsel %vm24_vm1, %v95_v52, 0.0  ;;  %v46_v2 = vrot.slane %v45_v53, 4  ;;  %v55_v3 = vrot.slane %v54_v54, 4  ;;  %v107_v4 = vsel %vm24_vm1, %v96_v55, 0.0 }
  0x11   :  { %v108_v5 = vsel %vm24_vm1, %v97_v56, 0.0  ;;  %v88_v6 = vrot.slane %v87_v57, 4  ;;  %v118_v7 = vsel %vm24_vm1, %v116_v58, 0.0  ;;  %v119_v8 = vsel %vm24_vm1, %v117_v59, 0.0 }
  0x12   :  { %v29_v9 = vadd.f32 %v28_v60, %v27_v45  ;;  %v100_v19 = vadd.f32 %v99_v1, %v98_v0  ;;  %v80_v20 = vadd.f32 %v79_v63, %v78_v50  ;;  %v109_v21 = vadd.f32 %v108_v5, %v107_v4 }
  0x13   :  { %v38_v22 = vadd.f32 %v37_v62, %v36_v49  ;;  %v47_v23 = vadd.f32 %v46_v2, %v45_v53  ;;  %v56_v24 = vadd.f32 %v55_v3, %v54_v54  ;;  %v120_v25 = vadd.f32 %v119_v8, %v118_v7 }
  0x14   :  { %879 = vperm.xlu0 %872, %v878_v10   ;;  %v71_v10 = vadd.f32 %v70_v61, %v69_v46  ;;  %v89_v26 = vadd.f32 %v88_v6, %v87_v57  ;;  %v30_v27 = vrot.slane %v29_v9, 2  ;;  %v101_v29 = vrot.slane %v100_v19, 4 }
  0x15   :  { %v81_v30 = vrot.slane %v80_v20, 2  ;;  %v110_v31 = vrot.slane %v109_v21, 4  ;;  %v39_v32 = vrot.slane %v38_v22, 2  ;;  %v48_v33 = vrot.slane %v47_v23, 2 }
  0x16   :  { %v72_v28 = vrot.slane %v71_v10, 2  ;;  %v57_v34 = vrot.slane %v56_v24, 2  ;;  %v121_v35 = vrot.slane %v120_v25, 4  ;;  %v90_v36 = vrot.slane %v89_v26, 2 }
  0x17   :  { %v31_v37 = vadd.f32 %v30_v27, %v29_v9  ;;  %v102_v39 = vadd.f32 %v101_v29, %v100_v19  ;;  %v82_v40 = vadd.f32 %v81_v30, %v80_v20  ;;  %v111_v41 = vadd.f32 %v110_v31, %v109_v21 }
  0x18   :  { %v73_v38 = vadd.f32 %v72_v28, %v71_v10  ;;  %v40_v42 = vadd.f32 %v39_v32, %v38_v22  ;;  %v49_v43 = vadd.f32 %v48_v33, %v47_v23  ;;  %v58_v44 = vadd.f32 %v57_v34, %v56_v24 }
  0x19   :  { %v122_v45 = vadd.f32 %v121_v35, %v120_v25  ;;  %v91_v46 = vadd.f32 %v90_v36, %v89_v26  ;;  %v32_v47 = vrot.slane %v31_v37, 1  ;;  %v103_v49 = vrot.slane %v102_v39, 2 }
  0x1a   :  { %v74_v48 = vrot.slane %v73_v38, 1  ;;  %v83_v50 = vrot.slane %v82_v40, 1  ;;  %v112_v51 = vrot.slane %v111_v41, 2  ;;  %v41_v52 = vrot.slane %v40_v42, 1 }
  0x1b   :  { %v50_v53 = vrot.slane %v49_v43, 1  ;;  %v59_v54 = vrot.slane %v58_v44, 1  ;;  %v123_v55 = vrot.slane %v122_v45, 2  ;;  %v92_v56 = vrot.slane %v91_v46, 1 }
  0x1c   :  { %v1070_v58 = vadd.f32 %v32_v47, %v31_v37  ;;  %v1072_v59 = vadd.f32 %v74_v48, %v73_v38  ;;  %v104_v60 = vadd.f32 %v103_v49, %v102_v39  ;;  %v1078_v63 = vadd.f32 %v83_v50, %v82_v40 }
  0x1d   :  { %v113_v0 = vadd.f32 %v112_v51, %v111_v41  ;;  %v1080_v1 = vadd.f32 %v41_v52, %v40_v42  ;;  %v1082_v2 = vadd.f32 %v50_v53, %v49_v43  ;;  %v1084_v3 = vadd.f32 %v59_v54, %v58_v44 }
  0x1e   :  { %v124_v4 = vadd.f32 %v123_v55, %v122_v45  ;;  %v1088_v7 = vadd.f32 %v92_v56, %v91_v46  ;;  %v105_v20 = vrot.slane %v104_v60, 1 }
  0x1f   :  { %v114_v24 = vrot.slane %v113_v0, 1 }
  0x20   :  { %v125_v28 = vrot.slane %v124_v4, 1  ;;  %v1111_v41 = vadd.f32 %v105_v20, %v104_v60 }
  0x21   :  { %v1113_v42 = vadd.f32 %v114_v24, %v113_v0 }
  0x22   :  { %v1115_v43 = vadd.f32 %v125_v28, %v124_v4 }
  0x7e   :  { %v875_v57 = vpop.permute.xlu0 %874 }
  0x7f   :  { %v1074_v61 = vunpack.i.h.bf16 %v875_v57   ;;  %v1076_v62 = vunpack.i.l.bf16 %v875_v57  }
  0x81   :  { %v169_v5 = vrot.slane %v1074_v61, 1  ;;  %v170_v6 = vrot.slane %v1074_v61, 2  ;;  %v166_v8 = vrot.slane %v1076_v62, 1  ;;  %v171_v9 = vrot.slane %v1074_v61, 3 }
  0x82   :  { %v167_v10 = vrot.slane %v1076_v62, 2  ;;  %v168_v19 = vrot.slane %v1076_v62, 3  ;;  %v194_v25 = vmul.f32 %v1076_v62, %v1070_v58  ;;  %v198_v27 = vmul.f32 %v1074_v61, %v1080_v1 }
  0x83   :  { %v195_v21 = vmul.f32 %v166_v8, %v1080_v1  ;;  %v199_v22 = vmul.f32 %v169_v5, %v1072_v59  ;;  %v200_v23 = vmul.f32 %v170_v6, %v1078_v63  ;;  %v201_v33 = vmul.f32 %v171_v9, %v1088_v7 }
  0x84   :  { %v196_v26 = vmul.f32 %v167_v10, %v1082_v2  ;;  %v197_v29 = vmul.f32 %v168_v19, %v1084_v3 }
  0x85   :  { %v226_v30 = vrot.slane %v195_v21, 7  ;;  %v235_v31 = vrot.slane %v199_v22, 7  ;;  %v237_v32 = vrot.slane %v200_v23, 6  ;;  %v239_v48 = vrot.slane %v201_v33, 5 }
  0x86   :  { %v229_v34 = vrot.slane %v196_v26, 6  ;;  %v880_v35 = vpop.permute.xlu0 %879  ;;  %v232_v44 = vrot.slane %v197_v29, 5 }
  0x87   :  { %v228_v36 = vsel %vm227_vm2, %v226_v30, %v194_v25  ;;  %v236_v37 = vsel %vm227_vm2, %v235_v31, %v198_v27  ;;  %v1106_v38 = vunpack.i.h.bf16 %v880_v35   ;;  %v1108_v39 = vunpack.i.l.bf16 %v880_v35  }
  0x88   :  { %v231_v40 = vsel %vm230_vm3, %v229_v34, %v228_v36  ;;  %v238_v45 = vsel %vm230_vm3, %v237_v32, %v236_v37 }
  0x89   :  { %v175_v46 = vrot.slane %v1106_v38, 1  ;;  %v176_v47 = vrot.slane %v1106_v38, 2  ;;  %v177_v49 = vrot.slane %v1106_v38, 3  ;;  %v172_v50 = vrot.slane %v1108_v39, 1 }
  0x8a   :  { %v234_v51 = vsel %vm233_vm4, %v232_v44, %v231_v40  ;;  %v173_v52 = vrot.slane %v1108_v39, 2  ;;  %v174_v53 = vrot.slane %v1108_v39, 3  ;;  %v240_v54 = vsel %vm233_vm4, %v239_v48, %v238_v45 }
  0x8b   :  { %v203_v55 = vmul.f32 %v172_v50, %v1078_v63  ;;  %v207_v56 = vmul.f32 %v175_v46, %v1088_v7  ;;  %v208_v57 = vmul.f32 %v176_v47, %v1113_v42  ;;  %v202_v60 = vmul.f32 %v1108_v39, %v1082_v2 }
  0x8c   :  { %v204_v0 = vmul.f32 %v173_v52, %v1111_v41  ;;  %v205_v4 = vmul.f32 %v174_v53, %v1113_v42  ;;  %v209_v5 = vmul.f32 %v177_v49, %v1115_v43  ;;  %v206_v6 = vmul.f32 %v1106_v38, %v1084_v3 }
  0x8d   :  { %v241_v8 = vrot.slane %v203_v55, 7  ;;  %v247_v9 = vrot.slane %v207_v56, 7  ;;  %v249_v10 = vrot.slane %v208_v57, 6  ;;  %v258_v19 = vsel %vm257_vm5, %v234_v51, 0.0 }
  0x8e   :  { %v259_v20 = vsel %vm257_vm5, %v240_v54, 0.0  ;;  %v243_v21 = vrot.slane %v204_v0, 6  ;;  %v245_v23 = vrot.slane %v205_v4, 5  ;;  %v251_v25 = vrot.slane %v209_v5, 5 }
  0x8f   :  { %v242_v22 = vsel %vm227_vm2, %v241_v8, %v202_v60  ;;  %v248_v24 = vsel %vm227_vm2, %v247_v9, %v206_v6  ;;  %v260_v28 = vadd.f32 %v259_v20, %v258_v19 }
  0x90   :  { %v244_v26 = vsel %vm230_vm3, %v243_v21, %v242_v22  ;;  %v250_v27 = vsel %vm230_vm3, %v249_v10, %v248_v24 }
  0x91   :  { %v246_v29 = vsel %vm233_vm4, %v245_v23, %v244_v26  ;;  %v252_v30 = vsel %vm233_vm4, %v251_v25, %v250_v27 }
  0x92   :  { %v261_v31 = vsel %vm257_vm5, %v246_v29, 0.0  ;;  %v263_v33 = vsel %vm257_vm5, %v252_v30, 0.0 }
  0x93   :  { %v262_v32 = vadd.f32 %v261_v31, %v260_v28 }
  0x95   :  { %v264_v34 = vadd.f32 %v263_v33, %v262_v32 }
  0x97   :  { %v265_v35 = vrot.slane %v264_v34, 4 }
  0x99   :  { %v266_v36 = vadd.f32 %v265_v35, %v264_v34 }
  0x9b   :  { %v267_v37 = vrot.slane %v266_v36, 2 }
  0x9d   :  { %v268_v40 = vadd.f32 %v267_v37, %v266_v36 }
  0x9f   :  { %v269_v44 = vrot.slane %v268_v40, 1 }
  0xa1   :  { %v270_v45 = vadd.f32 %v269_v44, %v268_v40 }
  0xa3   :  { %v271_v46 = vadd.f32 1e-30, %v270_v45 }
  0xa5   :  { %883 = vrcp.f32 %v271_v46  ;;  %v283_v52 = vand.u32 2147483648, %v271_v46  ;;  %v281_v55 = vand.u32 2147483647, %v271_v46  ;;  %vm277_vm7 = vweird.f32 %v271_v46 }
  0xa6   :  { %885 = vrsqrt.f32 %v271_v46 }
  0xa7   :  { %v284_v60 = vor.u32 1.1754944e-38, %v283_v52  ;;  %vm282_vm10 = vcmp.eq.f32.partialorder %v281_v55, 8.507059e+37  ;;  %v1564_v52 = vmov %v1076_v62 }
  0xab   :  { %v884_v47 = vpop.eup %883 }
  0xac   :  { %v1146_v48 = vpop.eup %885  ;;  %v273_v49 = vmul.f32 %v884_v47, %v271_v46  ;;  %vm278_vm6 = vweird.f32 %v884_v47 }
  0xad   :  { %v288_v50 = vmul.f32 %v1146_v48, %v271_v46  ;;  %vm279_vm8 = vmor %vm277_vm7, %vm278_vm6  ;;  %vm294_vm9 = vweird.f32 %v1146_v48 }
  0xae   :  { %v274_v51 = vsub.f32 1.0, %v273_v49  ;;  %vm1154_vm11 = vmor %vm277_vm7, %vm294_vm9  ;;  %v1561_v49 = vmov %v1106_v38 }
  0xaf   :  { %v289_v53 = vmul.f32 %v1146_v48, %v288_v50  ;;  %v1562_v50 = vmov %v1108_v39 }
  0xb0   :  { %v275_v54 = vmul.f32 %v884_v47, %v274_v51  ;;  %v1563_v51 = vmov %v1074_v61 }
  0xb1   :  { %v290_v56 = vmul.f32 0.5, %v289_v53 }
  0xb2   :  { %v276_v57 = vadd.f32 %v884_v47, %v275_v54 }
  0xb3   :  { %v291_v0 = vsub.f32 1.5, %v290_v56 }
  0xb4   :  { %v280_v4 = vsel %vm279_vm8, %v884_v47, %v276_v57 }
  0xb5   :  { %v285_v5 = vsel %vm282_vm10, %v284_v60, %v280_v4  ;;  %v1152_v6 = vmul.f32 %v1146_v48, %v291_v0 }
  0xb6   :  { %v297_v9 = vperm.slane %v285_v5, 0 }
  0xb7   :  { %v296_v10 = vsel %vm1154_vm11, %v1146_v48, %v1152_v6 }
  0xb8   :  { %v299_v19 = vmul.f32 %v297_v9, %v1080_v1  ;;  %v300_v20 = vmul.f32 %v297_v9, %v1082_v2  ;;  %v301_v21 = vmul.f32 %v297_v9, %v1084_v3  ;;  %v302_v22 = vmul.f32 %v297_v9, %v1072_v59 }
  0xb9   :  { %v303_v23 = vmul.f32 %v297_v9, %v1078_v63  ;;  %v304_v24 = vmul.f32 %v297_v9, %v1088_v7  ;;  %v305_v25 = vmul.f32 %v297_v9, %v1111_v41  ;;  %v298_v26 = vmul.f32 %v297_v9, %v1070_v58 }
  0xba   :  { %v306_v27 = vmul.f32 %v297_v9, %v1113_v42  ;;  %v318_v28 = vrot.slane %v299_v19, 7  ;;  %v320_v29 = vrot.slane %v300_v20, 6  ;;  %v307_v1 = vmul.f32 %v297_v9, %v1115_v43 }
  0xbb   :  { %v322_v30 = vrot.slane %v301_v21, 5  ;;  %v324_v2 = vrot.slane %v302_v22, 7  ;;  %v326_v31 = vrot.slane %v303_v23, 6  ;;  %v328_v59 = vrot.slane %v304_v24, 5 }
  0xbc   :  { %v319_v3 = vsel %vm227_vm2, %v318_v28, %v298_v26  ;;  %v330_v32 = vrot.slane %v303_v23, 7  ;;  %v332_v63 = vrot.slane %v305_v25, 6  ;;  %v336_v33 = vrot.slane %v304_v24, 7 }
  0xbd   :  { %v321_v7 = vsel %vm230_vm3, %v320_v29, %v319_v3  ;;  %v325_v41 = vsel %vm227_vm2, %v324_v2, %v299_v19  ;;  %v338_v58 = vrot.slane %v306_v27, 6  ;;  %v334_v35 = vrot.slane %v306_v27, 5 }
  0xbe   :  { %v323_v42 = vsel %vm233_vm4, %v322_v30, %v321_v7   ;;  %v327_v34 = vsel %vm230_vm3, %v326_v31, %v325_v41  ;;  %v331_v43 = vsel %vm227_vm2, %v330_v32, %v300_v20  ;;  %v337_v40 = vsel %vm227_vm2, %v336_v33, %v301_v21 }
  0xbf   :  { %v329_v36 = vsel %vm233_vm4, %v328_v59, %v327_v34   ;;  %v333_v37 = vsel %vm230_vm3, %v332_v63, %v331_v43  ;;  %v340_v44 = vrot.slane %v307_v1, 5  ;;  %v339_v46 = vsel %vm230_vm3, %v338_v58, %v337_v40 }
  0xc0   :  { %v335_v45 = vsel %vm233_vm4, %v334_v35, %v333_v37  }
  0xc1   :  { %v341_v47 = vsel %vm233_vm4, %v340_v44, %v339_v46  }
  0xc2 LB: > { %v1234_v53 = vmul.f32 1.5, %v1076_v62  ;;  %v1237_v54 = vmul.f32 1.5, %v1074_v61  ;;  %v1240_v55 = vmul.f32 1.5, %v1108_v39  ;;  %v1243_v56 = vmul.f32 1.5, %v1106_v38  ;;  %s351_s0 = sadd.s32 1, %s957_s0   ;;  %s957_s0 = sphi %s1204_s0, %s351_s0   ;;  %v953_v42 = vphi %v323_v42, %v1352_v42   ;;  %v949_v36 = vphi %v329_v36, %v1355_v36   ;;  %v945_v45 = vphi %v335_v45, %v1360_v45   ;;  %v941_v47 = vphi %v341_v47, %v1569_v47   ;;  %v937_v52 = vphi %v1564_v52, %v1568_v52   ;;  %v933_v51 = vphi %v1563_v51, %v1567_v51   ;;  %v929_v50 = vphi %v1562_v50, %v1566_v50   ;;  %v925_v49 = vphi %v1561_v49, %v1565_v49  }
  0xc3   : > { %v368_v57 = vrot.slane %v937_v52, 1  ;;  %v369_v60 = vrot.slane %v937_v52, 2  ;;  %v370_v0 = vrot.slane %v937_v52, 3  ;;  %v371_v4 = vrot.slane %v933_v51, 1  ;;  %p348_p0 = scmp.ge.s32.totalorder %s351_s0, 18  }
  0xc4   : > { %v372_v5 = vrot.slane %v933_v51, 2  ;;  %v373_v9 = vrot.slane %v933_v51, 3  ;;  %v374_v19 = vrot.slane %v929_v50, 1  ;;  %v375_v20 = vrot.slane %v929_v50, 2 }
  0xc5   : > { %v376_v21 = vrot.slane %v929_v50, 3  ;;  %v377_v22 = vrot.slane %v925_v49, 1  ;;  %v378_v23 = vrot.slane %v925_v49, 2  ;;  %v379_v24 = vrot.slane %v925_v49, 3 }
  0xc6   : > { %v380_v25 = vperm.slane %v937_v52, 0  ;;  %v381_v26 = vperm.slane %v368_v57, 0  ;;  %v382_v27 = vperm.slane %v369_v60, 0  ;;  %v383_v28 = vperm.slane %v370_v0, 0 }
  0xc7   : > { %v384_v29 = vperm.slane %v933_v51, 0  ;;  %v385_v1 = vperm.slane %v371_v4, 0  ;;  %v386_v30 = vperm.slane %v372_v5, 0  ;;  %v387_v2 = vperm.slane %v373_v9, 0 }
  0xc8   : > { %v388_v31 = vperm.slane %v929_v50, 0  ;;  %v389_v3 = vperm.slane %v374_v19, 0  ;;  %v390_v59 = vperm.slane %v375_v20, 0  ;;  %v391_v32 = vperm.slane %v376_v21, 0 }
  0xc9   : > { %v392_v63 = vperm.slane %v925_v49, 0  ;;  %v393_v7 = vperm.slane %v377_v22, 0  ;;  %v394_v41 = vperm.slane %v378_v23, 0  ;;  %v395_v33 = vperm.slane %v379_v24, 0 }
  0xca   : > { %v412_v58 = vmul.f32 %v953_v42, %v380_v25  ;;  %v413_v34 = vmul.f32 %v949_v36, %v381_v26  ;;  %v414_v43 = vmul.f32 %v945_v45, %v382_v27  ;;  %v415_v35 = vmul.f32 %v941_v47, %v383_v28 }
  0xcb   : > { %v416_v37 = vmul.f32 %v953_v42, %v384_v29  ;;  %v417_v40 = vmul.f32 %v949_v36, %v385_v1  ;;  %v418_v44 = vmul.f32 %v945_v45, %v386_v30  ;;  %v419_v46 = vmul.f32 %v941_v47, %v387_v2 }
  0xcc   : > { %v420_v57 = vmul.f32 %v953_v42, %v388_v31  ;;  %v421_v60 = vmul.f32 %v949_v36, %v389_v3  ;;  %v422_v0 = vmul.f32 %v945_v45, %v390_v59  ;;  %v423_v4 = vmul.f32 %v941_v47, %v391_v32 }
  0xcd   : > { %v424_v5 = vmul.f32 %v953_v42, %v392_v63  ;;  %v425_v9 = vmul.f32 %v949_v36, %v393_v7  ;;  %v426_v19 = vmul.f32 %v945_v45, %v394_v41  ;;  %v427_v20 = vmul.f32 %v941_v47, %v395_v33 }
  0xce   : > { %v428_v21 = vsel %vm257_vm5, %v412_v58, 0.0  ;;  %v429_v22 = vsel %vm257_vm5, %v413_v34, 0.0  ;;  %v431_v23 = vsel %vm257_vm5, %v414_v43, 0.0  ;;  %v433_v24 = vsel %vm257_vm5, %v415_v35, 0.0 }
  0xcf   : > { %v430_v25 = vadd.f32 %v429_v22, %v428_v21  ;;  %v435_v26 = vsel %vm257_vm5, %v416_v37, 0.0  ;;  %v436_v27 = vsel %vm257_vm5, %v417_v40, 0.0  ;;  %v438_v28 = vsel %vm257_vm5, %v418_v44, 0.0 }
  0xd0   : > { %v437_v29 = vadd.f32 %v436_v27, %v435_v26  ;;  %v440_v1 = vsel %vm257_vm5, %v419_v46, 0.0  ;;  %v442_v30 = vsel %vm257_vm5, %v420_v57, 0.0  ;;  %v443_v2 = vsel %vm257_vm5, %v421_v60, 0.0 }
  0xd1   : > { %v432_v31 = vadd.f32 %v431_v23, %v430_v25  ;;  %v444_v3 = vadd.f32 %v443_v2, %v442_v30  ;;  %v445_v59 = vsel %vm257_vm5, %v422_v0, 0.0  ;;  %v447_v32 = vsel %vm257_vm5, %v423_v4, 0.0 }
  0xd2   : > { %v439_v63 = vadd.f32 %v438_v28, %v437_v29  ;;  %v449_v7 = vsel %vm257_vm5, %v424_v5, 0.0  ;;  %v450_v41 = vsel %vm257_vm5, %v425_v9, 0.0  ;;  %v452_v33 = vsel %vm257_vm5, %v426_v19, 0.0 }
  0xd3   : > { %v434_v58 = vadd.f32 %v433_v24, %v432_v31  ;;  %v446_v34 = vadd.f32 %v445_v59, %v444_v3  ;;  %v451_v43 = vadd.f32 %v450_v41, %v449_v7  ;;  %v454_v35 = vsel %vm257_vm5, %v427_v20, 0.0 }
  0xd4   : > { %v441_v37 = vadd.f32 %v440_v1, %v439_v63  ;;  %v468_v40 = vrot.slane %v953_v42, 1  ;;  %v469_v44 = vrot.slane %v953_v42, 2  ;;  %v470_v46 = vrot.slane %v953_v42, 3 }
  0xd5   : > { %v448_v57 = vadd.f32 %v447_v32, %v446_v34  ;;  %v453_v60 = vadd.f32 %v452_v33, %v451_v43  ;;  %v456_v0 = vmul.f32 0.5, %v434_v58  ;;  %v471_v4 = vrot.slane %v949_v36, 1 }
  0xd6   : > { %v457_v5 = vmul.f32 0.5, %v441_v37  ;;  %v472_v9 = vrot.slane %v949_v36, 2  ;;  %v473_v19 = vrot.slane %v949_v36, 3  ;;  %v474_v21 = vrot.slane %v945_v45, 1 }
  0xd7   : > { %v455_v20 = vadd.f32 %v454_v35, %v453_v60  ;;  %v458_v22 = vmul.f32 0.5, %v448_v57  ;;  %v1301_v23 = vsub.f32 %v1234_v53, %v456_v0  ;;  %v475_v24 = vrot.slane %v945_v45, 2 }
  0xd8   : > { %v1305_v25 = vsub.f32 %v1237_v54, %v457_v5  ;;  %v476_v26 = vrot.slane %v945_v45, 3  ;;  %v477_v27 = vrot.slane %v941_v47, 1  ;;  %v478_v28 = vrot.slane %v941_v47, 2 }
  0xd9   : > { %v459_v29 = vmul.f32 0.5, %v455_v20  ;;  %v1311_v1 = vsub.f32 %v1240_v55, %v458_v22  ;;  %v479_v30 = vrot.slane %v941_v47, 3  ;;  %v480_v53 = vperm.slane %v953_v42, 0 }
  0xda   : > { %v481_v2 = vperm.slane %v468_v40, 0  ;;  %v482_v31 = vperm.slane %v469_v44, 0  ;;  %v483_v3 = vperm.slane %v470_v46, 0  ;;  %v484_v54 = vperm.slane %v949_v36, 0 }
  0xdb   : > { %v1317_v59 = vsub.f32 %v1243_v56, %v459_v29  ;;  %v485_v32 = vperm.slane %v471_v4, 0  ;;  %v486_v63 = vperm.slane %v472_v9, 0  ;;  %v487_v7 = vperm.slane %v473_v19, 0 }
  0xdc   : > { %v488_v41 = vperm.slane %v945_v45, 0  ;;  %v489_v33 = vperm.slane %v474_v21, 0  ;;  %v490_v55 = vperm.slane %v475_v24, 0  ;;  %v491_v58 = vperm.slane %v476_v26, 0 }
  0xdd   : > { %v492_v34 = vperm.slane %v941_v47, 0  ;;  %v493_v43 = vperm.slane %v477_v27, 0  ;;  %v494_v42 = vperm.slane %v478_v28, 0  ;;  %v495_v35 = vperm.slane %v479_v30, 0 }
  0xde   : > { %v512_v37 = vmul.f32 %v480_v53, %v1301_v23  ;;  %v513_v36 = vmul.f32 %v481_v2, %v1305_v25  ;;  %v514_v56 = vmul.f32 %v482_v31, %v1311_v1  ;;  %v515_v40 = vmul.f32 %v483_v3, %v1317_v59 }
  0xdf   : > { %v516_v44 = vmul.f32 %v484_v54, %v1301_v23  ;;  %v517_v45 = vmul.f32 %v485_v32, %v1305_v25  ;;  %v518_v46 = vmul.f32 %v486_v63, %v1311_v1  ;;  %v519_v57 = vmul.f32 %v487_v7, %v1317_v59 }
  0xe0   : > { %v520_v47 = vmul.f32 %v488_v41, %v1301_v23  ;;  %v521_v60 = vmul.f32 %v489_v33, %v1305_v25  ;;  %v522_v0 = vmul.f32 %v490_v55, %v1311_v1  ;;  %v523_v4 = vmul.f32 %v491_v58, %v1317_v59 }
  0xe1   : > { %v524_v5 = vmul.f32 %v492_v34, %v1301_v23  ;;  %v525_v9 = vmul.f32 %v493_v43, %v1305_v25  ;;  %v526_v19 = vmul.f32 %v494_v42, %v1311_v1  ;;  %v527_v21 = vmul.f32 %v495_v35, %v1317_v59 }
  0xe2   : > { %v528_v20 = vsel %vm257_vm5, %v512_v37, 0.0  ;;  %v529_v22 = vsel %vm257_vm5, %v513_v36, 0.0  ;;  %v531_v24 = vsel %vm257_vm5, %v514_v56, 0.0  ;;  %v533_v26 = vsel %vm257_vm5, %v515_v40, 0.0 }
  0xe3   : > { %v530_v27 = vadd.f32 %v529_v22, %v528_v20  ;;  %v535_v28 = vsel %vm257_vm5, %v516_v44, 0.0  ;;  %v536_v29 = vsel %vm257_vm5, %v517_v45, 0.0  ;;  %v538_v30 = vsel %vm257_vm5, %v518_v46, 0.0 }
  0xe4   : > { %v537_v53 = vadd.f32 %v536_v29, %v535_v28  ;;  %v540_v2 = vsel %vm257_vm5, %v519_v57, 0.0  ;;  %v542_v31 = vsel %vm257_vm5, %v520_v47, 0.0  ;;  %v543_v3 = vsel %vm257_vm5, %v521_v60, 0.0 }
  0xe5   : > { %v532_v54 = vadd.f32 %v531_v24, %v530_v27  ;;  %v544_v32 = vadd.f32 %v543_v3, %v542_v31  ;;  %v545_v63 = vsel %vm257_vm5, %v522_v0, 0.0  ;;  %v547_v7 = vsel %vm257_vm5, %v523_v4, 0.0 }
  0xe6   : > { %v539_v41 = vadd.f32 %v538_v30, %v537_v53  ;;  %v549_v33 = vsel %vm257_vm5, %v524_v5, 0.0  ;;  %v550_v55 = vsel %vm257_vm5, %v525_v9, 0.0  ;;  %v552_v58 = vsel %vm257_vm5, %v526_v19, 0.0 }
  0xe7   : > { %v1352_v42 = vadd.f32 %v533_v26, %v532_v54   ;;  %v546_v34 = vadd.f32 %v545_v63, %v544_v32  ;;  %v551_v43 = vadd.f32 %v550_v55, %v549_v33  ;;  %v554_v35 = vsel %vm257_vm5, %v527_v21, 0.0 }
  0xe8   : > { %v1355_v36 = vadd.f32 %v540_v2, %v539_v41   ;;  %v560_v37 = vrot.slane %v1301_v23, 1  ;;  %v561_v56 = vrot.slane %v1301_v23, 2  ;;  %v562_v40 = vrot.slane %v1301_v23, 3 }
  0xe9   : > { %v1360_v45 = vadd.f32 %v547_v7, %v546_v34   ;;  %v553_v44 = vadd.f32 %v552_v58, %v551_v43  ;;  %v563_v46 = vrot.slane %v1305_v25, 1  ;;  %v564_v57 = vrot.slane %v1305_v25, 2 }
  0xea   : > { %v565_v47 = vrot.slane %v1305_v25, 3  ;;  %v566_v60 = vrot.slane %v1311_v1, 1  ;;  %v567_v0 = vrot.slane %v1311_v1, 2  ;;  %v568_v4 = vrot.slane %v1311_v1, 3 }
  0xeb   : > { %v1368_v5 = vadd.f32 %v554_v35, %v553_v44   ;;  %v569_v9 = vrot.slane %v1317_v59, 1  ;;  %v570_v19 = vrot.slane %v1317_v59, 2  ;;  %v571_v21 = vrot.slane %v1317_v59, 3 }
  0xec   : > { %v572_v20 = vperm.slane %v1301_v23, 0  ;;  %v573_v22 = vperm.slane %v560_v37, 0  ;;  %v574_v24 = vperm.slane %v561_v56, 0  ;;  %v575_v26 = vperm.slane %v562_v40, 0 }
  0xed   : > { %v576_v27 = vperm.slane %v1305_v25, 0  ;;  %v577_v28 = vperm.slane %v563_v46, 0  ;;  %v578_v29 = vperm.slane %v564_v57, 0  ;;  %v579_v30 = vperm.slane %v565_v47, 0 }
  0xee   : > { %v580_v53 = vperm.slane %v1311_v1, 0  ;;  %v581_v2 = vperm.slane %v566_v60, 0  ;;  %v582_v31 = vperm.slane %v567_v0, 0  ;;  %v583_v3 = vperm.slane %v568_v4, 0 }
  0xef   : > { %v584_v54 = vperm.slane %v1317_v59, 0  ;;  %v585_v32 = vperm.slane %v569_v9, 0  ;;  %v586_v63 = vperm.slane %v570_v19, 0  ;;  %v587_v7 = vperm.slane %v571_v21, 0 }
  0xf0   : > { %v604_v23 = vmul.f32 %v937_v52, %v572_v20  ;;  %v605_v41 = vmul.f32 %v933_v51, %v573_v22  ;;  %v606_v33 = vmul.f32 %v929_v50, %v574_v24  ;;  %v607_v25 = vmul.f32 %v925_v49, %v575_v26 }
  0xf1   : > { %v608_v55 = vmul.f32 %v937_v52, %v576_v27  ;;  %v609_v1 = vmul.f32 %v933_v51, %v577_v28  ;;  %v610_v58 = vmul.f32 %v929_v50, %v578_v29  ;;  %v611_v34 = vmul.f32 %v925_v49, %v579_v30 }
  0xf2   : > { %v612_v59 = vmul.f32 %v937_v52, %v580_v53  ;;  %v613_v43 = vmul.f32 %v933_v51, %v581_v2  ;;  %v614_v35 = vmul.f32 %v929_v50, %v582_v31  ;;  %v615_v37 = vmul.f32 %v925_v49, %v583_v3 }
  0xf3   : > { %v616_v56 = vmul.f32 %v937_v52, %v584_v54  ;;  %v617_v40 = vmul.f32 %v933_v51, %v585_v32  ;;  %v618_v44 = vmul.f32 %v929_v50, %v586_v63  ;;  %v619_v46 = vmul.f32 %v925_v49, %v587_v7 }
  0xf4   : > { %v620_v57 = vsel %vm257_vm5, %v604_v23, 0.0  ;;  %v621_v47 = vsel %vm257_vm5, %v605_v41, 0.0  ;;  %v623_v60 = vsel %vm257_vm5, %v606_v33, 0.0  ;;  %v625_v0 = vsel %vm257_vm5, %v607_v25, 0.0 }
  0xf5   : > { %v622_v4 = vadd.f32 %v621_v47, %v620_v57  ;;  %v627_v9 = vsel %vm257_vm5, %v608_v55, 0.0  ;;  %v628_v19 = vsel %vm257_vm5, %v609_v1, 0.0  ;;  %v630_v52 = vsel %vm257_vm5, %v610_v58, 0.0 }
  0xf6   : > { %v629_v51 = vadd.f32 %v628_v19, %v627_v9  ;;  %v632_v50 = vsel %vm257_vm5, %v611_v34, 0.0  ;;  %v634_v49 = vsel %vm257_vm5, %v612_v59, 0.0  ;;  %v635_v21 = vsel %vm257_vm5, %v613_v43, 0.0 }
  0xf7   : > { %v624_v20 = vadd.f32 %v623_v60, %v622_v4  ;;  %v636_v22 = vadd.f32 %v635_v21, %v634_v49  ;;  %v637_v24 = vsel %vm257_vm5, %v614_v35, 0.0  ;;  %v639_v26 = vsel %vm257_vm5, %v615_v37, 0.0 }
  0xf8   : > { %v631_v27 = vadd.f32 %v630_v52, %v629_v51  ;;  %v641_v28 = vsel %vm257_vm5, %v616_v56, 0.0  ;;  %v642_v29 = vsel %vm257_vm5, %v617_v40, 0.0  ;;  %v644_v30 = vsel %vm257_vm5, %v618_v44, 0.0 }
  0xf9   : > { %v626_v53 = vadd.f32 %v625_v0, %v624_v20   ;;  %v638_v2 = vadd.f32 %v637_v24, %v636_v22  ;;  %v643_v31 = vadd.f32 %v642_v29, %v641_v28  ;;  %v646_v54 = vsel %vm257_vm5, %v619_v46, 0.0 }
  0xfa   : > { %v633_v3 = vadd.f32 %v632_v50, %v631_v27   ;;  %v1569_v47 = vmov %v1368_v5  ;;  %v648_v23 = vperm.slane (%p348_p0), %v296_v10, 0 }
  0xfb   : > { %v640_v32 = vadd.f32 %v639_v26, %v638_v2   ;;  %v645_v63 = vadd.f32 %v644_v30, %v643_v31  ;;  %v1568_v52 = vmov %v626_v53  ;;  %350 = sbr.rel (!%p348_p0) target bundleno = 194 (0xc2), region = 31 }
  0xfc   : > { %v1567_v51 = vmov %v633_v3  ;;  %v1437_v41 = vmul.f32 (%p348_p0), %v648_v23, %v626_v53  ;;  %v1439_v5 = vmul.f32 (%p348_p0), %v648_v23, %v633_v3 }
  0xfd   : > { %v647_v7 = vadd.f32 %v646_v54, %v645_v63   ;;  %v1566_v50 = vmov %v640_v32  ;;  %v1441_v33 = vmul.f32 (%p348_p0), %v648_v23, %v640_v32 }
  0xfe   :  { %v653_v55 = vperm.slane (%p348_p0), %v1437_v41, 0  ;;  %v654_v42 = vperm.slane (%p348_p0), %v1439_v5, 0  ;;  %v679_v62 = vperm.slane (%p348_p0), %v1437_v41, 1  ;;  %v680_v38 = vperm.slane (%p348_p0), %v1439_v5, 1 }
  0xff   : > { %v1565_v49 = vmov %v647_v7  ;;  %v1443_v25 = vmul.f32 (%p348_p0), %v648_v23, %v647_v7  ;;  %v655_v1 = vperm.slane (%p348_p0), %v1441_v33, 0  ;;  %v681_v39 = vperm.slane (%p348_p0), %v1441_v33, 1 }
 0x100   :  { %v657_v6 = vmul.f32 %v653_v55, %v973_v11  ;;  %v659_v8 = vmul.f32 %v654_v42, %v983_v13  ;;  %v658_v45 = vmul.f32 %v653_v55, %v978_v12  ;;  %v660_v58 = vmul.f32 %v654_v42, %v988_v14 }
 0x101   :  { %v656_v61 = vperm.slane %v1443_v25, 0  ;;  %v682_v48 = vperm.slane %v1443_v25, 1  ;;  %v661_v10 = vmul.f32 %v655_v1, %v993_v15  ;;  %v662_v34 = vmul.f32 %v655_v1, %v998_v16 }
 0x102   :  { %v665_v43 = vsel %vm24_vm1, %v657_v6, 0.0  ;;  %v666_v35 = vsel %vm24_vm1, %v659_v8, 0.0  ;;  %v672_v44 = vsel %vm24_vm1, %v658_v45, 0.0  ;;  %v673_v46 = vsel %vm24_vm1, %v660_v58, 0.0 }
 0x103   :  { %v663_v36 = vmul.f32 %v656_v61, %v1003_v17  ;;  %v664_v59 = vmul.f32 %v656_v61, %v1008_v18  ;;  %v668_v37 = vsel %vm24_vm1, %v661_v10, 0.0  ;;  %v667_v40 = vadd.f32 %v666_v35, %v665_v43 }
 0x104   :  { %v675_v57 = vsel %vm24_vm1, %v662_v34, 0.0  ;;  %v674_v47 = vadd.f32 %v673_v46, %v672_v44  ;;  %v683_v0 = vmul.f32 %v679_v62, %v973_v11  ;;  %v685_v4 = vmul.f32 %v680_v38, %v983_v13 }
 0x105   :  { %v670_v56 = vsel %vm24_vm1, %v663_v36, 0.0  ;;  %v677_v60 = vsel %vm24_vm1, %v664_v59, 0.0  ;;  %v669_v9 = vadd.f32 %v668_v37, %v667_v40  ;;  %v687_v19 = vmul.f32 %v681_v39, %v993_v15 }
 0x106   :  { %v689_v52 = vmul.f32 %v682_v48, %v1003_v17  ;;  %v684_v51 = vmul.f32 %v679_v62, %v978_v12  ;;  %v676_v50 = vadd.f32 %v675_v57, %v674_v47  ;;  %v691_v49 = vsel %vm24_vm1, %v683_v0, 0.0 }
 0x107   :  { %v692_v21 = vsel %vm24_vm1, %v685_v4, 0.0  ;;  %v686_v20 = vmul.f32 %v680_v38, %v988_v14  ;;  %v671_v22 = vadd.f32 %v670_v56, %v669_v9  ;;  %v694_v26 = vsel %vm24_vm1, %v687_v19, 0.0 }
 0x108   :  { %v693_v24 = vadd.f32 %v692_v21, %v691_v49  ;;  %v696_v27 = vsel %vm24_vm1, %v689_v52, 0.0  ;;  %v678_v28 = vadd.f32 %v677_v60, %v676_v50  ;;  %v688_v29 = vmul.f32 %v681_v39, %v998_v16 }
 0x109   :  { %v690_v30 = vmul.f32 %v682_v48, %v1008_v18  ;;  %v698_v53 = vsel %vm24_vm1, %v684_v51, 0.0  ;;  %757 = vst.msk [vmem:[%s1557_s1] sm:$0xff] %vm24_vm1, %v671_v22  ;;  %v699_v31 = vsel %vm24_vm1, %v686_v20, 0.0  ;;  %v705_v3 = vperm.slane %v1437_v41, 2 }
 0x10a   :  { %v695_v2 = vadd.f32 %v694_v26, %v693_v24  ;;  %v706_v54 = vperm.slane %v1439_v5, 2  ;;  %758 = vst.msk [vmem:[%s1557_s1 + $0x8] sm:$0xff] %vm24_vm1, %v678_v28  ;;  %v700_v32 = vadd.f32 %v699_v31, %v698_v53  ;;  %v701_v63 = vsel %vm24_vm1, %v688_v29, 0.0 }
 0x10b   :  { %v703_v7 = vsel %vm24_vm1, %v690_v30, 0.0  ;;  %v707_v23 = vperm.slane %v1441_v33, 2  ;;  %v708_v42 = vperm.slane %v1443_v25, 2  ;;  %v709_v1 = vmul.f32 %v705_v3, %v973_v11 }
 0x10c   :  { %v697_v55 = vadd.f32 %v696_v27, %v695_v2  ;;  %v711_v61 = vmul.f32 %v706_v54, %v983_v13  ;;  %v702_v62 = vadd.f32 %v701_v63, %v700_v32  ;;  %v710_v39 = vmul.f32 %v705_v3, %v978_v12 }
 0x10d   :  { %v713_v38 = vmul.f32 %v707_v23, %v993_v15  ;;  %v712_v48 = vmul.f32 %v706_v54, %v988_v14  ;;  %v715_v6 = vmul.f32 %v708_v42, %v1003_v17  ;;  %v717_v8 = vsel %vm24_vm1, %v709_v1, 0.0 }
 0x10e   :  { %759 = vst.msk [vmem:[%s1557_s1 + $0x10] sm:$0xff] %vm24_vm1, %v697_v55  ;;  %v718_v10 = vsel %vm24_vm1, %v711_v61, 0.0  ;;  %v714_v36 = vmul.f32 %v707_v23, %v998_v16  ;;  %v704_v45 = vadd.f32 %v703_v7, %v702_v62  ;;  %v716_v59 = vmul.f32 %v708_v42, %v1008_v18 }
 0x10f   :  { %v719_v58 = vadd.f32 %v718_v10, %v717_v8  ;;  %v720_v34 = vsel %vm24_vm1, %v713_v38, 0.0  ;;  %v722_v43 = vsel %vm24_vm1, %v715_v6, 0.0  ;;  %v724_v35 = vsel %vm24_vm1, %v710_v39, 0.0 }
 0x110   :  { %v725_v37 = vsel %vm24_vm1, %v712_v48, 0.0  ;;  %v727_v56 = vsel %vm24_vm1, %v714_v36, 0.0  ;;  %760 = vst.msk [vmem:[%s1557_s1 + $0x18] sm:$0xff] %vm24_vm1, %v704_v45  ;;  %v731_v46 = vperm.slane %v1437_v41, 3  ;;  %v729_v57 = vsel %vm24_vm1, %v716_v59, 0.0 }
 0x111   :  { %v721_v40 = vadd.f32 %v720_v34, %v719_v58  ;;  %v726_v44 = vadd.f32 %v725_v37, %v724_v35  ;;  %v732_v47 = vperm.slane %v1439_v5, 3  ;;  %v733_v60 = vperm.slane %v1441_v33, 3 }
 0x112   :  { %v734_v0 = vperm.slane %v1443_v25, 3  ;;  %v735_v19 = vmul.f32 %v731_v46, %v973_v11  ;;  %v736_v52 = vmul.f32 %v731_v46, %v978_v12 }
 0x113   :  { %v723_v4 = vadd.f32 %v722_v43, %v721_v40  ;;  %v728_v9 = vadd.f32 %v727_v56, %v726_v44  ;;  %v737_v51 = vmul.f32 %v732_v47, %v983_v13  ;;  %v739_v50 = vmul.f32 %v733_v60, %v993_v15 }
 0x114   :  { %v741_v41 = vmul.f32 %v734_v0, %v1003_v17  ;;  %v738_v49 = vmul.f32 %v732_v47, %v988_v14  ;;  %v743_v33 = vsel %vm24_vm1, %v735_v19, 0.0  ;;  %v740_v11 = vmul.f32 %v733_v60, %v998_v16 }
 0x115   :  { %761 = vst.msk [vmem:[%s1557_s1 + $0x20] sm:$0xff] %vm24_vm1, %v723_v4  ;;  %v730_v5 = vadd.f32 %v729_v57, %v728_v9  ;;  %v742_v12 = vmul.f32 %v734_v0, %v1008_v18  ;;  %v744_v13 = vsel %vm24_vm1, %v737_v51, 0.0  ;;  %v746_v15 = vsel %vm24_vm1, %v739_v50, 0.0 }
 0x116   :  { %v750_v17 = vsel %vm24_vm1, %v736_v52, 0.0  ;;  %v745_v14 = vadd.f32 %v744_v13, %v743_v33  ;;  %v751_v25 = vsel %vm24_vm1, %v738_v49, 0.0  ;;  %v753_v21 = vsel %vm24_vm1, %v740_v11, 0.0 }
 0x117   :  { %762 = vst.msk [vmem:[%s1557_s1 + $0x28] sm:$0xff] %vm24_vm1, %v730_v5  ;;  %v748_v16 = vsel %vm24_vm1, %v741_v41, 0.0  ;;  %v752_v20 = vadd.f32 %v751_v25, %v750_v17  ;;  %v755_v22 = vsel %vm24_vm1, %v742_v12, 0.0 }
 0x118   :  { %v747_v18 = vadd.f32 %v746_v15, %v745_v14 }
 0x119   :  { %v754_v24 = vadd.f32 %v753_v21, %v752_v20 }
 0x11a   :  { %v749_v26 = vadd.f32 %v748_v16, %v747_v18 }
 0x11b   :  { %v756_v27 = vadd.f32 %v755_v22, %v754_v24 }
 0x11c   :  { %763 = vst.msk [vmem:[%s1557_s1 + $0x30] sm:$0xff] %vm24_vm1, %v749_v26 }
 0x11d   :  { %764 = vst.msk [vmem:[%s1557_s1 + $0x38] sm:$0xff] %vm24_vm1, %v756_v27 }

</bundles_post_ra>
